<compile_context>
chip_gen: v5e
topology: v5e:2x2
jax: 0.10.0
libtpu: 0.0.40
codegen_flags: <defaults>
</compile_context>

<pallas_src>
import jax
import jax.numpy as jnp
from jax.experimental import pallas as pl
from jax.experimental.pallas import tpu as pltpu


def _cdiv(a, b):
    return -(-a // b)


def mlp_kernel(params_ref, x_ref, o_ref):
    # params_ref (SMEM, 7 scalars): [w1_0, w1_1, b1_0, b1_1, w2_0, w2_1, b2]
    # x_ref / o_ref: (TILE_R, LANE_W) lane-dense f32 blocks.
    x = x_ref[...]

    w1_0 = params_ref[0]
    w1_1 = params_ref[1]
    b1_0 = params_ref[2]
    b1_1 = params_ref[3]
    w2_0 = params_ref[4]
    w2_1 = params_ref[5]
    b2_0 = params_ref[6]

    # layer1: Linear(1, 2) + ReLU, done as two scalar FMAs on the VPU.
    h0 = jnp.maximum(x * w1_0 + b1_0, 0.0)
    h1 = jnp.maximum(x * w1_1 + b1_1, 0.0)

    # layer2: Linear(2, 1) + ReLU.
    o_ref[...] = jnp.maximum(h0 * w2_0 + h1 * w2_1 + b2_0, 0.0)


def nonlinear_regression(x, w1, b1, w2, b2):
    """x: (N, 1) float32; weights in x@W layout (w1:(1,2), b1:(1,2), w2:(2,1), b2:(1,1)).

    Returns (N, 1) float32 = relu(relu(x @ w1 + b1) @ w2 + b2).
    """
    n, in_feat = x.shape
    assert in_feat == 1, "NonLinearRegression expects 1 input feature"
    dtype = x.dtype

    LANE_W = 1024                                   # lane-dense last dim (multiple of 128)
    rows_needed = max(1, _cdiv(n, LANE_W))
    # Block rows: multiple of 8, capped so one block is <= 2 MiB f32 (pipelines well and
    # stays far under v5e's 16 MiB scoped VMEM / v7x's 64 MiB physical VMEM).
    TILE_R = min(512, max(8, _cdiv(rows_needed, 8) * 8))
    rows = _cdiv(rows_needed, TILE_R) * TILE_R
    padded = rows * LANE_W

    # Pack the 7 parameters into a single SMEM scalar vector.
    params = jnp.concatenate(
        [w1.reshape(-1), b1.reshape(-1), w2.reshape(-1), b2.reshape(-1)]
    ).astype(jnp.float32)

    flat = jnp.pad(x.reshape(-1), (0, padded - n))
    x2d = flat.reshape(rows, LANE_W)

    out2d = pl.pallas_call(
        mlp_kernel,
        out_shape=jax.ShapeDtypeStruct((rows, LANE_W), dtype),
        grid_spec=pltpu.PrefetchScalarGridSpec(
            num_scalar_prefetch=0,
            grid=(rows // TILE_R,),
            in_specs=[
                pl.BlockSpec(memory_space=pltpu.MemorySpace.SMEM),   # params (scalars)
                pl.BlockSpec((TILE_R, LANE_W), lambda i: (i, 0)),    # x slab
            ],
            out_specs=pl.BlockSpec((TILE_R, LANE_W), lambda i: (i, 0)),
        ),
        compiler_params=pltpu.CompilerParams(
            dimension_semantics=("parallel",),        # lets v7x shard tiles across 2 TCs
        ),
        cost_estimate=pl.CostEstimate(
            flops=8 * padded, transcendentals=0, bytes_accessed=8 * padded
        ),
    )(params, x2d)

    # Trim zero-padding (padded rows may hold relu(b)-style garbage).
    return out2d.reshape(-1)[:n].reshape(n, 1)


if __name__ == "__main__":
    key = jax.random.PRNGKey(0)
    k_x, k_w1, k_b1, k_w2, k_b2 = jax.random.split(key, 5)

    batch = 8
    # Input: (batch, 1), matching nn.Linear(1, 2) input features.
    x = jax.random.normal(k_x, (batch, 1), dtype=jnp.float32)

    # PyTorch Linear weight is (out, in); we keep the transposed (in, out) layout so the
    # reference is simply x @ W + b.
    w1 = jax.random.normal(k_w1, (1, 2), dtype=jnp.float32) * 0.5   # Linear(1,2).weight.T
    b1 = jax.random.normal(k_b1, (1, 2), dtype=jnp.float32) * 0.1   # Linear(1,2).bias
    w2 = jax.random.normal(k_w2, (2, 1), dtype=jnp.float32) * 0.5   # Linear(2,1).weight.T
    b2 = jax.random.normal(k_b2, (1, 1), dtype=jnp.float32) * 0.1   # Linear(2,1).bias

    out = nonlinear_regression(x, w1, b1, w2, b2)
    out = jax.block_until_ready(out)

    # Pure-JAX reference check.
    ref = jnp.maximum(jnp.maximum(x @ w1 + b1, 0.0) @ w2 + b2, 0.0)
    assert out.shape == (batch, 1)
    assert jnp.allclose(out, ref, atol=1e-5), "mismatch vs reference"

    print("KERNEL_OK")
</pallas_src>

<mosaic_0001>
module attributes {stable_mosaic.version = 11 : i64} {
  func.func @mlp_kernel(%arg0: i32, %arg1: memref<7xf32, #tpu.memory_space<smem>>, %arg2: memref<8x1024xf32, #tpu.memory_space<vmem>>, %arg3: memref<8x1024xf32, #tpu.memory_space<vmem>>) attributes {dimension_semantics = [#tpu.dimension_semantics<parallel>], iteration_bounds = array<i64: 1>, scalar_prefetch = 0 : i64, scratch_operands = 0 : i64, tpu.core_type = #tpu.core_type<tc>, window_params = [{transform_indices = @transform_0, window_bounds = array<i64: 7>}, {transform_indices = @transform_1, window_bounds = array<i64: 8, 1024>}, {transform_indices = @transform_2, window_bounds = array<i64: 8, 1024>}]} {
    %c0 = arith.constant 0 : index
    %c0_0 = arith.constant 0 : index
    %0 = vector.load %arg2[%c0, %c0_0] : memref<8x1024xf32, #tpu.memory_space<vmem>>, vector<8x1024xf32>
    %c0_1 = arith.constant 0 : index
    %1 = memref.load %arg1[%c0_1] : memref<7xf32, #tpu.memory_space<smem>>
    %c1 = arith.constant 1 : index
    %2 = memref.load %arg1[%c1] : memref<7xf32, #tpu.memory_space<smem>>
    %c2 = arith.constant 2 : index
    %3 = memref.load %arg1[%c2] : memref<7xf32, #tpu.memory_space<smem>>
    %c3 = arith.constant 3 : index
    %4 = memref.load %arg1[%c3] : memref<7xf32, #tpu.memory_space<smem>>
    %c4 = arith.constant 4 : index
    %5 = memref.load %arg1[%c4] : memref<7xf32, #tpu.memory_space<smem>>
    %c5 = arith.constant 5 : index
    %6 = memref.load %arg1[%c5] : memref<7xf32, #tpu.memory_space<smem>>
    %c6 = arith.constant 6 : index
    %7 = memref.load %arg1[%c6] : memref<7xf32, #tpu.memory_space<smem>>
    %8 = vector.broadcast %1 : f32 to vector<8x1024xf32>
    %9 = arith.mulf %0, %8 : vector<8x1024xf32>
    %10 = vector.broadcast %3 : f32 to vector<8x1024xf32>
    %11 = arith.addf %9, %10 : vector<8x1024xf32>
    %cst = arith.constant 0.000000e+00 : f32
    %12 = vector.broadcast %cst : f32 to vector<8x1024xf32>
    %13 = arith.maximumf %11, %12 : vector<8x1024xf32>
    %14 = vector.broadcast %2 : f32 to vector<8x1024xf32>
    %15 = arith.mulf %0, %14 : vector<8x1024xf32>
    %16 = vector.broadcast %4 : f32 to vector<8x1024xf32>
    %17 = arith.addf %15, %16 : vector<8x1024xf32>
    %cst_2 = arith.constant 0.000000e+00 : f32
    %18 = vector.broadcast %cst_2 : f32 to vector<8x1024xf32>
    %19 = arith.maximumf %17, %18 : vector<8x1024xf32>
    %20 = vector.broadcast %5 : f32 to vector<8x1024xf32>
    %21 = arith.mulf %13, %20 : vector<8x1024xf32>
    %22 = vector.broadcast %6 : f32 to vector<8x1024xf32>
    %23 = arith.mulf %19, %22 : vector<8x1024xf32>
    %24 = arith.addf %21, %23 : vector<8x1024xf32>
    %25 = vector.broadcast %7 : f32 to vector<8x1024xf32>
    %26 = arith.addf %24, %25 : vector<8x1024xf32>
    %cst_3 = arith.constant 0.000000e+00 : f32
    %27 = vector.broadcast %cst_3 : f32 to vector<8x1024xf32>
    %28 = arith.maximumf %26, %27 : vector<8x1024xf32>
    %c0_4 = arith.constant 0 : index
    %c0_5 = arith.constant 0 : index
    %29 = vector.load %arg3[%c0_4, %c0_5] : memref<8x1024xf32, #tpu.memory_space<vmem>>, vector<8x1024xf32>
    tpu.vector_store %arg3[%c0_4, %c0_5], %28 {strides = array<i32>} : memref<8x1024xf32, #tpu.memory_space<vmem>>, vector<8x1024xf32>,
    return
  }
  func.func @transform_0(%arg0: i32) -> i32 {
    %c0_i32 = arith.constant 0 : i32
    %c0_i32_0 = arith.constant 0 : i32
    return %c0_i32 : i32
  }
  func.func @transform_1(%arg0: i32) -> (i32, i32) {
    %c0_i32 = arith.constant 0 : i32
    %c0_i32_0 = arith.constant 0 : i32
    return %arg0, %c0_i32 : i32, i32
  }
  func.func @transform_2(%arg0: i32) -> (i32, i32) {
    %c0_i32 = arith.constant 0 : i32
    %c0_i32_0 = arith.constant 0 : i32
    return %arg0, %c0_i32 : i32, i32
  }
}

</mosaic_0001>

<bundles_post_ra>
// kernel: tpu_custom_call.1
= control target key start
LH: loop header
LB: loop body
LE: loop exit
PB: predicated region body
PF: predicated region fallthrough
CT: control target
= control target key end

     0   :  { %7 = vsyncpa [#allocation5], 0  ;;  %s347_s0 = inlined_call_operand.hbm [shape: f32[7], index: 0, kind: input, shape index: {}]   ;;  %s348_s1 = inlined_call_operand.hbm [shape: f32[8,1024], index: 1, kind: input, shape index: {}]   ;;  %s349_s2 = inlined_call_operand.hbm [shape: f32[8,1024], index: 2, kind: output, shape index: {}]  }
   0x1   :  { %8 = vsyncpa [#allocation3], 0 }
   0x2   :  { %9 = vsyncpa [#allocation4], 0  ;;  %s15_s11 = sshll.u32 %s347_s0, 4  ;;  %s24_s14 = sshll.u32 %s348_s1, 4  ;;  %s16_s11 = int_to_ptr.hbm [resolvable:$true] %s15_s11  ;;  %s25_s14 = int_to_ptr.hbm [resolvable:$true] %s24_s14 }
   0x3   :  { %s250_s15 = smov [#allocation2]   ;;  %s251_s16 = smov [#allocation6]  }
   0x4   :  { %18 = dma.hbm_to_smem %s16_s11, 16, %s250_s15, [#allocation5]  }
   0x5   :  { %s26_s17 = sshll.u32 %s251_s16, 4  ;;  %s27_s17 = int_to_ptr.vmem [resolvable:$true] %s26_s17 }
   0x6   :  { %29 = dma.hbm_to_vmem [thread:$0]  %s25_s14, 1024, %s27_s17, [#allocation3]  }
   0x7   :  { %244 = dma.done.wait [#allocation5], 16  }
   0x8   :  { %245 = vsyncadd [#allocation5], 4294967280 }
   0x9   :  { %246 = dma.done.wait [#allocation3], 1024  }
   0xa   :  { %247 = vsyncadd [#allocation3], 4294966272 }
   0xb   :  { %38 = sfence }
   0xc   :  { %s47_s18 = sld [smem:[#allocation2]]  ;;  %v39_v0 = vld [vmem:[#allocation6] sm:$0xff]  ;;  %v40_v1 = vld [vmem:[#allocation6 + $0x8] sm:$0xff]  ;;  %v41_v2 = vld [vmem:[#allocation6 + $0x10] sm:$0xff]  ;;  %s252_s23 = smov [#allocation7]  }
   0xd   :  { %s175_s19 = sld [smem:[#allocation2 + $0x1]]  ;;  %v42_v20 = vld [vmem:[#allocation6 + $0x18] sm:$0xff]  ;;  %v43_v29 = vld [vmem:[#allocation6 + $0x20] sm:$0xff]  ;;  %v44_v30 = vld [vmem:[#allocation6 + $0x28] sm:$0xff]  ;;  %s162_s24 = sshll.u32 %s252_s23, 4  ;;  %s163_s24 = int_to_ptr.vmem [resolvable:$true] %s162_s24 }
   0xe   :  { %s176_s0 = sld [smem:[#allocation2 + $0x2]]  ;;  %v45_v58 = vld [vmem:[#allocation6 + $0x30] sm:$0xff]  ;;  %v46_v59 = vld [vmem:[#allocation6 + $0x38] sm:$0xff]  ;;  %s164_s27 = sshll.u32 %s349_s2, 4  ;;  %s165_s27 = int_to_ptr.hbm [resolvable:$true] %s164_s27 }
   0xf   :  { %s177_s20 = sld [smem:[#allocation2 + $0x3]] }
  0x10   :  { %s178_s21 = sld [smem:[#allocation2 + $0x4]] }
  0x11   :  { %s179_s1 = sld [smem:[#allocation2 + $0x5]] }
  0x12   :  { %s180_s22 = sld [smem:[#allocation2 + $0x6]]  ;;  %v274_v3 = vstv %s47_s18 }
  0x13   :  { %v55_v4 = vmul.f32 %v274_v3, %v39_v0  ;;  %v277_v5 = vstv %s175_s19  ;;  %v56_v6 = vmul.f32 %v274_v3, %v40_v1  ;;  %v57_v7 = vmul.f32 %v274_v3, %v41_v2 }
  0x14   :  { %v281_v8 = vstv %s176_s0  ;;  %v81_v9 = vmul.f32 %v277_v5, %v39_v0  ;;  %v82_v10 = vmul.f32 %v277_v5, %v40_v1  ;;  %v83_v11 = vmul.f32 %v277_v5, %v41_v2 }
  0x15   :  { %v64_v12 = vadd.f32 %v281_v8, %v55_v4  ;;  %v287_v13 = vstv %s177_s20  ;;  %v65_v14 = vadd.f32 %v281_v8, %v56_v6  ;;  %v66_v15 = vadd.f32 %v281_v8, %v57_v7 }
  0x16   :  { %v90_v16 = vadd.f32 %v287_v13, %v81_v9  ;;  %v292_v17 = vstv %s178_s21  ;;  %v91_v18 = vadd.f32 %v287_v13, %v82_v10  ;;  %v92_v19 = vadd.f32 %v287_v13, %v83_v11 }
  0x17   :  { %v72_v21 = vmax.f32 %v64_v12, 0.0  ;;  %v296_v22 = vstv %s179_s1  ;;  %v73_v23 = vmax.f32 %v65_v14, 0.0  ;;  %v74_v24 = vmax.f32 %v66_v15, 0.0 }
  0x18   :  { %v98_v25 = vmax.f32 %v90_v16, 0.0  ;;  %v298_v26 = vstv %s180_s22  ;;  %v99_v27 = vmax.f32 %v91_v18, 0.0  ;;  %v100_v28 = vmax.f32 %v92_v19, 0.0 }
  0x19   :  { %v107_v31 = vmul.f32 %v292_v17, %v72_v21  ;;  %v108_v32 = vmul.f32 %v292_v17, %v73_v23  ;;  %v109_v33 = vmul.f32 %v292_v17, %v74_v24  ;;  %v58_v34 = vmul.f32 %v274_v3, %v42_v20 }
  0x1a   :  { %v116_v35 = vmul.f32 %v296_v22, %v98_v25  ;;  %v117_v36 = vmul.f32 %v296_v22, %v99_v27  ;;  %v118_v37 = vmul.f32 %v296_v22, %v100_v28  ;;  %v84_v38 = vmul.f32 %v277_v5, %v42_v20 }
  0x1b   :  { %v67_v39 = vadd.f32 %v281_v8, %v58_v34  ;;  %v59_v40 = vmul.f32 %v274_v3, %v43_v29  ;;  %v85_v41 = vmul.f32 %v277_v5, %v43_v29  ;;  %v60_v42 = vmul.f32 %v274_v3, %v44_v30 }
  0x1c   :  { %v124_v43 = vadd.f32 %v116_v35, %v107_v31  ;;  %v125_v44 = vadd.f32 %v117_v36, %v108_v32  ;;  %v126_v45 = vadd.f32 %v118_v37, %v109_v33  ;;  %v93_v46 = vadd.f32 %v287_v13, %v84_v38 }
  0x1d   :  { %v75_v47 = vmax.f32 %v67_v39, 0.0  ;;  %v68_v48 = vadd.f32 %v281_v8, %v59_v40  ;;  %v94_v49 = vadd.f32 %v287_v13, %v85_v41  ;;  %v69_v50 = vadd.f32 %v281_v8, %v60_v42 }
  0x1e   :  { %v133_v51 = vadd.f32 %v298_v26, %v124_v43  ;;  %v134_v52 = vadd.f32 %v298_v26, %v125_v44  ;;  %v135_v53 = vadd.f32 %v298_v26, %v126_v45  ;;  %v101_v54 = vmax.f32 %v93_v46, 0.0 }
  0x1f   :  { %v110_v55 = vmul.f32 %v292_v17, %v75_v47  ;;  %v76_v56 = vmax.f32 %v68_v48, 0.0  ;;  %v102_v57 = vmax.f32 %v94_v49, 0.0  ;;  %v77_v2 = vmax.f32 %v69_v50, 0.0 }
  0x20   :  { %v141_v60 = vmax.f32 %v133_v51, 0.0  ;;  %v142_v61 = vmax.f32 %v134_v52, 0.0  ;;  %v143_v62 = vmax.f32 %v135_v53, 0.0  ;;  %v119_v63 = vmul.f32 %v296_v22, %v101_v54 }
  0x21   :  { %v111_v0 = vmul.f32 %v292_v17, %v76_v56  ;;  %v120_v1 = vmul.f32 %v296_v22, %v102_v57  ;;  %v86_v4 = vmul.f32 %v277_v5, %v44_v30  ;;  %v61_v7 = vmul.f32 %v274_v3, %v45_v58 }
  0x22   :  { %149 = vst [vmem:[#allocation7] sm:$0xff] %v141_v60  ;;  %v127_v6 = vadd.f32 %v119_v63, %v110_v55  ;;  %v87_v9 = vmul.f32 %v277_v5, %v45_v58  ;;  %v62_v10 = vmul.f32 %v274_v3, %v46_v59  ;;  %v88_v14 = vmul.f32 %v277_v5, %v46_v59 }
  0x23   :  { %150 = vst [vmem:[#allocation7 + $0x8] sm:$0xff] %v142_v61  ;;  %v128_v11 = vadd.f32 %v120_v1, %v111_v0  ;;  %v95_v12 = vadd.f32 %v287_v13, %v86_v4  ;;  %v70_v16 = vadd.f32 %v281_v8, %v61_v7  ;;  %v112_v3 = vmul.f32 %v292_v17, %v77_v2 }
  0x24   :  { %151 = vst [vmem:[#allocation7 + $0x10] sm:$0xff] %v143_v62  ;;  %v136_v15 = vadd.f32 %v298_v26, %v127_v6  ;;  %v96_v18 = vadd.f32 %v287_v13, %v87_v9  ;;  %v71_v19 = vadd.f32 %v281_v8, %v62_v10  ;;  %v97_v23 = vadd.f32 %v287_v13, %v88_v14 }
  0x25   :  { %v137_v20 = vadd.f32 %v298_v26, %v128_v11  ;;  %v103_v21 = vmax.f32 %v95_v12, 0.0  ;;  %v78_v25 = vmax.f32 %v70_v16, 0.0 }
  0x26   :  { %v144_v24 = vmax.f32 %v136_v15, 0.0  ;;  %v104_v27 = vmax.f32 %v96_v18, 0.0  ;;  %v79_v5 = vmax.f32 %v71_v19, 0.0  ;;  %v105_v30 = vmax.f32 %v97_v23, 0.0 }
  0x27   :  { %v145_v28 = vmax.f32 %v137_v20, 0.0  ;;  %v121_v29 = vmul.f32 %v296_v22, %v103_v21  ;;  %v113_v31 = vmul.f32 %v292_v17, %v78_v25 }
  0x28   :  { %152 = vst [vmem:[#allocation7 + $0x18] sm:$0xff] %v144_v24  ;;  %v122_v8 = vmul.f32 %v296_v22, %v104_v27  ;;  %v114_v32 = vmul.f32 %v292_v17, %v79_v5  ;;  %v123_v34 = vmul.f32 %v296_v22, %v105_v30 }
  0x29   :  { %153 = vst [vmem:[#allocation7 + $0x20] sm:$0xff] %v145_v28  ;;  %v129_v33 = vadd.f32 %v121_v29, %v112_v3 }
  0x2a   :  { %v130_v13 = vadd.f32 %v122_v8, %v113_v31  ;;  %v131_v36 = vadd.f32 %v123_v34, %v114_v32 }
  0x2b   :  { %v138_v35 = vadd.f32 %v298_v26, %v129_v33 }
  0x2c   :  { %v139_v37 = vadd.f32 %v298_v26, %v130_v13  ;;  %v140_v39 = vadd.f32 %v298_v26, %v131_v36 }
  0x2d   :  { %v146_v38 = vmax.f32 %v138_v35, 0.0 }
  0x2e   :  { %v147_v17 = vmax.f32 %v139_v37, 0.0  ;;  %v148_v40 = vmax.f32 %v140_v39, 0.0 }
  0x2f   :  { %154 = vst [vmem:[#allocation7 + $0x28] sm:$0xff] %v146_v38 }
  0x30   :  { %155 = vst [vmem:[#allocation7 + $0x30] sm:$0xff] %v147_v17 }
  0x31   :  { %156 = vst [vmem:[#allocation7 + $0x38] sm:$0xff] %v148_v40 }
  0x32   :  { %167 = dma.vmem_to_hbm [thread:$0]  %s163_s24, 1024, %s165_s27, [#allocation4]  }
  0x33   :  { %248 = dma.done.wait [#allocation4], 1024  }
  0x34   :  { %249 = vsyncadd [#allocation4], 4294966272 }
  0x35   :  { %172 = vsyncpa [#allocation3], 1 }
  0x36   :  { %173 = vsyncpa [#allocation4], 1 }
  0x37   :  { %174 = vsyncpa [#allocation5], 1 }

</bundles_post_ra>
